<compile_context>
chip_gen: v7x
topology: tpu7x:2x2x1
jax: 0.10.0
libtpu: 0.0.40
codegen_flags: <defaults>
</compile_context>

<pallas_src>
import functools

import jax
import jax.numpy as jnp
from jax.experimental import pallas as pl
from jax.experimental.pallas import tpu as pltpu


def _conv3d_block_kernel(xs_ref, w_ref, b_ref, mask_ref, out_ref, *, Qp, He, We, inv_cnt):
    """Per-sample fused conv + InstanceNorm3d + LeakyReLU(0.2).

    xs_ref  : (1, 8*C_in, Pe_pad) bf16  -- phase-decomposed, spatially flattened, zero-padded input
    w_ref   : (8, C_out, 8*C_in) bf16   -- one (C_out, 8*C_in) matrix per (sd, sh, sw) shift
    b_ref   : (C_out, 1) f32
    mask_ref: (1, Qp) f32               -- 1.0 on valid output columns, 0.0 on halo/pad columns
    out_ref : (1, C_out, Qp) f32        -- flattened with padded spatial strides (He*We, We, 1)
    """
    C_out = out_ref.shape[1]
    HeWe = He * We

    # 8 shift matmuls of the (stride-1, k=2) phase-space conv; static unrolled loop,
    # static lane offsets, f32 accumulation on the MXU.
    acc = jnp.zeros((C_out, Qp), jnp.float32)
    for s in range(8):
        sd, sh, sw = (s >> 2) & 1, (s >> 1) & 1, s & 1
        off = sd * HeWe + sh * We + sw
        rhs = xs_ref[0, :, off:off + Qp]                                 # (8*C_in, Qp) bf16
        acc = acc + jnp.dot(w_ref[s], rhs, preferred_element_type=jnp.float32)

    acc = acc + b_ref[...]                                               # bias, broadcast over lanes

    # InstanceNorm3d (affine=False, eps=1e-5): biased variance over the valid spatial positions.
    m = mask_ref[...]                                                    # (1, Qp)
    mean = jnp.sum(acc * m, axis=1, keepdims=True) * inv_cnt             # (C_out, 1)
    cen = acc - mean
    var = jnp.sum(cen * cen * m, axis=1, keepdims=True) * inv_cnt
    y = cen * jax.lax.rsqrt(var + 1e-5)

    # LeakyReLU(0.2)
    y = jnp.where(y >= 0.0, y, 0.2 * y)
    out_ref[0] = y.astype(out_ref.dtype)                                 # unmasked lane-dense store


@jax.jit
def conv3d_block(x, weight, bias):
    """x: (N, C_in, D, H, W) f32; weight: (C_out, C_in, 4, 4, 4); bias: (C_out,). k=4, s=2, p=1."""
    N, C_in, D, H, W = x.shape
    C_out = weight.shape[0]
    pad = 1
    assert D % 2 == 0 and H % 2 == 0 and W % 2 == 0, "even spatial dims expected for k=4,s=2,p=1"
    Do, Ho, Wo = D // 2, H // 2, W // 2
    De, He, We = Do + 1, Ho + 1, Wo + 1            # per-phase (padded) spatial extents
    HeWe = He * We
    Pe = De * HeWe                                 # per-phase flattened extent (real data)
    off_max = HeWe + We + 1                        # largest shift offset used by the kernel
    Q = (Do - 1) * HeWe + (Ho - 1) * We + Wo       # columns holding real (+halo) output positions
    Qp = ((Q + 127) // 128) * 128                  # lane-dense, 128-aligned kernel output width
    Pe_pad = Qp + off_max                          # input lane extent so every shift slice fits
    CKp = 8 * C_in

    # ---- cheap layout work in XLA (~1x input bytes): pad, space-to-depth, flatten, cast bf16 ----
    xp = jnp.pad(x, ((0, 0), (0, 0), (pad, pad), (pad, pad), (pad, pad)))
    xr = xp.reshape(N, C_in, De, 2, He, 2, We, 2)              # (n, c, jd, pd, jh, ph, jw, pw)
    xr = xr.transpose(0, 3, 5, 7, 1, 2, 4, 6)                  # (n, pd, ph, pw, c, jd, jh, jw)
    xs = xr.reshape(N, CKp, Pe).astype(jnp.bfloat16)
    xs = jnp.pad(xs, ((0, 0), (0, 0), (0, Pe_pad - Pe)))       # zero tail for lane alignment

    # Weights: kd = 2*sd + pd (etc.) -> 8 shift matrices over the 8*C_in phase channels.
    w8 = weight.reshape(C_out, C_in, 2, 2, 2, 2, 2, 2)         # (co, c, sd, pd, sh, ph, sw, pw)
    wstack = w8.transpose(2, 4, 6, 0, 3, 5, 7, 1)              # (sd, sh, sw, co, pd, ph, pw, c)
    wstack = wstack.reshape(8, C_out, CKp).astype(jnp.bfloat16)
    b2 = bias.reshape(C_out, 1).astype(jnp.float32)

    # Valid-column mask (halo + alignment-pad columns excluded from the InstanceNorm statistics).
    qi = jnp.arange(Qp)
    valid = (qi < Q) & (((qi // We) % He) < Ho) & ((qi % We) < Wo)   # od < Do holds for all q < Q
    maskf = valid.astype(jnp.float32).reshape(1, Qp)

    kernel = functools.partial(_conv3d_block_kernel, Qp=Qp, He=He, We=We,
                               inv_cnt=1.0 / float(Do * Ho * Wo))

    out = pl.pallas_call(
        kernel,
        out_shape=jax.ShapeDtypeStruct((N, C_out, Qp), jnp.float32),
        grid=(N,),
        in_specs=[
            pl.BlockSpec((1, CKp, Pe_pad), lambda n: (n, 0, 0)),
            pl.BlockSpec((8, C_out, CKp), lambda n: (0, 0, 0)),   # grid-invariant -> resident
            pl.BlockSpec((C_out, 1), lambda n: (0, 0)),           # grid-invariant -> resident
            pl.BlockSpec((1, Qp), lambda n: (0, 0)),              # grid-invariant -> resident
        ],
        out_specs=pl.BlockSpec((1, C_out, Qp), lambda n: (n, 0, 0)),
        compiler_params=pltpu.CompilerParams(
            dimension_semantics=("parallel",),
            vmem_limit_bytes=32 * 1024 * 1024,
        ),
    )(xs, wstack, b2, maskf)

    # Result is already (N, C_out, spatial): drop alignment pad, pad back to the halo grid,
    # reshape, drop halo rows.
    out = jnp.pad(out[:, :, :Q], ((0, 0), (0, 0), (0, Pe - Q)))
    out = out.reshape(N, C_out, De, He, We)[:, :, :Do, :Ho, :Wo]
    return out


def _reference(x, weight, bias, stride=2, pad=1):
    """Pure-JAX f32 reference mirroring PyTorch Conv3d + InstanceNorm3d + LeakyReLU(0.2)."""
    dn = jax.lax.conv_dimension_numbers(x.shape, weight.shape, ("NCDHW", "OIDHW", "NCDHW"))
    y = jax.lax.conv_general_dilated(
        x, weight, window_strides=(stride, stride, stride),
        padding=[(pad, pad)] * 3, dimension_numbers=dn)
    y = y + bias[None, :, None, None, None]
    mean = y.mean(axis=(2, 3, 4), keepdims=True)
    var = ((y - mean) ** 2).mean(axis=(2, 3, 4), keepdims=True)
    y = (y - mean) * jax.lax.rsqrt(var + 1e-5)
    return jnp.where(y >= 0, y, 0.2 * y)


if __name__ == "__main__":
    # Small shapes: batch=2, in_channels=4, out_channels=8, spatial D=H=W=8.
    N, C_in, C_out, S, K = 2, 4, 8, 8, 4
    key = jax.random.PRNGKey(0)
    kx, kw, kb = jax.random.split(key, 3)

    x = jax.random.normal(kx, (N, C_in, S, S, S), dtype=jnp.float32)

    # Deterministic parameter init (shapes per nn.Conv3d(C_in, C_out, 4, 2, 1)).
    fan_in = C_in * K * K * K
    bound = 1.0 / (fan_in ** 0.5)
    weight = jax.random.uniform(kw, (C_out, C_in, K, K, K), jnp.float32, -bound, bound)
    bias = jax.random.uniform(kb, (C_out,), jnp.float32, -bound, bound)

    out = conv3d_block(x, weight, bias)
    out = jax.block_until_ready(out)

    ref = _reference(x, weight, bias)
    assert out.shape == ref.shape == (N, C_out, S // 2, S // 2, S // 2)
    # bf16 matmul inputs (f32 accumulation / norm / activation): compare against the f32
    # reference with a correspondingly looser tolerance.
    assert jnp.allclose(out, ref, atol=3e-2, rtol=3e-2)

    print("KERNEL_OK")
</pallas_src>

<mosaic_0001>
module attributes {stable_mosaic.version = 11 : i64} {
  func.func @_conv3d_block_kernel(%arg0: i32, %arg1: memref<1x32x159xbf16, #tpu.memory_space<vmem>>, %arg2: memref<8x8x32xbf16, #tpu.memory_space<vmem>>, %arg3: memref<8x1xf32, #tpu.memory_space<vmem>>, %arg4: memref<1x128xf32, #tpu.memory_space<vmem>>, %arg5: memref<1x8x128xf32, #tpu.memory_space<vmem>>) attributes {dimension_semantics = [#tpu.dimension_semantics<parallel>], iteration_bounds = array<i64: 2>, scalar_prefetch = 0 : i64, scratch_operands = 0 : i64, tpu.core_type = #tpu.core_type<tc>, window_params = [{transform_indices = @transform_0, window_bounds = array<i64: 1, 32, 159>}, {pipeline_mode = #tpu.pipeline_mode<synchronous>, transform_indices = @transform_1, window_bounds = array<i64: 8, 8, 32>}, {pipeline_mode = #tpu.pipeline_mode<synchronous>, transform_indices = @transform_2, window_bounds = array<i64: 8, 1>}, {pipeline_mode = #tpu.pipeline_mode<synchronous>, transform_indices = @transform_3, window_bounds = array<i64: 1, 128>}, {transform_indices = @transform_4, window_bounds = array<i64: 1, 8, 128>}]} {
    %cst = arith.constant 0.000000e+00 : f32
    %0 = vector.broadcast %cst : f32 to vector<8x128xf32>
    %c0 = arith.constant 0 : index
    %c0_0 = arith.constant 0 : index
    %c0_1 = arith.constant 0 : index
    %1 = vector.load %arg1[%c0, %c0_0, %c0_1] : memref<1x32x159xbf16, #tpu.memory_space<vmem>>, vector<1x32x128xbf16>
    %2 = vector.shape_cast %1 : vector<1x32x128xbf16> to vector<32x128xbf16>
    %c0_2 = arith.constant 0 : index
    %c0_3 = arith.constant 0 : index
    %c0_4 = arith.constant 0 : index
    %3 = vector.load %arg2[%c0_2, %c0_3, %c0_4] : memref<8x8x32xbf16, #tpu.memory_space<vmem>>, vector<1x8x32xbf16>
    %4 = vector.shape_cast %3 : vector<1x8x32xbf16> to vector<8x32xbf16>
    %cst_5 = arith.constant dense<0.000000e+00> : vector<8x128xf32>
    %5 = tpu.matmul %4, %2, %cst_5 {dimension_numbers = #tpu.dot_dimension_numbers<[1], [0], [0], [1], [0, 0, 1, 1], [], []>} : vector<8x32xbf16>, vector<32x128xbf16>, vector<8x128xf32> -> vector<8x128xf32>
    %6 = arith.addf %0, %5 : vector<8x128xf32>
    %c0_6 = arith.constant 0 : index
    %c0_7 = arith.constant 0 : index
    %c1 = arith.constant 1 : index
    %7 = vector.load %arg1[%c0_6, %c0_7, %c1] : memref<1x32x159xbf16, #tpu.memory_space<vmem>>, vector<1x32x128xbf16>
    %8 = vector.shape_cast %7 : vector<1x32x128xbf16> to vector<32x128xbf16>
    %c1_8 = arith.constant 1 : index
    %c0_9 = arith.constant 0 : index
    %c0_10 = arith.constant 0 : index
    %9 = vector.load %arg2[%c1_8, %c0_9, %c0_10] : memref<8x8x32xbf16, #tpu.memory_space<vmem>>, vector<1x8x32xbf16>
    %10 = vector.shape_cast %9 : vector<1x8x32xbf16> to vector<8x32xbf16>
    %cst_11 = arith.constant dense<0.000000e+00> : vector<8x128xf32>
    %11 = tpu.matmul %10, %8, %cst_11 {dimension_numbers = #tpu.dot_dimension_numbers<[1], [0], [0], [1], [0, 0, 1, 1], [], []>} : vector<8x32xbf16>, vector<32x128xbf16>, vector<8x128xf32> -> vector<8x128xf32>
    %12 = arith.addf %6, %11 : vector<8x128xf32>
    %c0_12 = arith.constant 0 : index
    %c0_13 = arith.constant 0 : index
    %c5 = arith.constant 5 : index
    %13 = vector.load %arg1[%c0_12, %c0_13, %c5] : memref<1x32x159xbf16, #tpu.memory_space<vmem>>, vector<1x32x128xbf16>
    %14 = vector.shape_cast %13 : vector<1x32x128xbf16> to vector<32x128xbf16>
    %c2 = arith.constant 2 : index
    %c0_14 = arith.constant 0 : index
    %c0_15 = arith.constant 0 : index
    %15 = vector.load %arg2[%c2, %c0_14, %c0_15] : memref<8x8x32xbf16, #tpu.memory_space<vmem>>, vector<1x8x32xbf16>
    %16 = vector.shape_cast %15 : vector<1x8x32xbf16> to vector<8x32xbf16>
    %cst_16 = arith.constant dense<0.000000e+00> : vector<8x128xf32>
    %17 = tpu.matmul %16, %14, %cst_16 {dimension_numbers = #tpu.dot_dimension_numbers<[1], [0], [0], [1], [0, 0, 1, 1], [], []>} : vector<8x32xbf16>, vector<32x128xbf16>, vector<8x128xf32> -> vector<8x128xf32>
    %18 = arith.addf %12, %17 : vector<8x128xf32>
    %c0_17 = arith.constant 0 : index
    %c0_18 = arith.constant 0 : index
    %c6 = arith.constant 6 : index
    %19 = vector.load %arg1[%c0_17, %c0_18, %c6] : memref<1x32x159xbf16, #tpu.memory_space<vmem>>, vector<1x32x128xbf16>
    %20 = vector.shape_cast %19 : vector<1x32x128xbf16> to vector<32x128xbf16>
    %c3 = arith.constant 3 : index
    %c0_19 = arith.constant 0 : index
    %c0_20 = arith.constant 0 : index
    %21 = vector.load %arg2[%c3, %c0_19, %c0_20] : memref<8x8x32xbf16, #tpu.memory_space<vmem>>, vector<1x8x32xbf16>
    %22 = vector.shape_cast %21 : vector<1x8x32xbf16> to vector<8x32xbf16>
    %cst_21 = arith.constant dense<0.000000e+00> : vector<8x128xf32>
    %23 = tpu.matmul %22, %20, %cst_21 {dimension_numbers = #tpu.dot_dimension_numbers<[1], [0], [0], [1], [0, 0, 1, 1], [], []>} : vector<8x32xbf16>, vector<32x128xbf16>, vector<8x128xf32> -> vector<8x128xf32>
    %24 = arith.addf %18, %23 : vector<8x128xf32>
    %c0_22 = arith.constant 0 : index
    %c0_23 = arith.constant 0 : index
    %c25 = arith.constant 25 : index
    %25 = vector.load %arg1[%c0_22, %c0_23, %c25] : memref<1x32x159xbf16, #tpu.memory_space<vmem>>, vector<1x32x128xbf16>
    %26 = vector.shape_cast %25 : vector<1x32x128xbf16> to vector<32x128xbf16>
    %c4 = arith.constant 4 : index
    %c0_24 = arith.constant 0 : index
    %c0_25 = arith.constant 0 : index
    %27 = vector.load %arg2[%c4, %c0_24, %c0_25] : memref<8x8x32xbf16, #tpu.memory_space<vmem>>, vector<1x8x32xbf16>
    %28 = vector.shape_cast %27 : vector<1x8x32xbf16> to vector<8x32xbf16>
    %cst_26 = arith.constant dense<0.000000e+00> : vector<8x128xf32>
    %29 = tpu.matmul %28, %26, %cst_26 {dimension_numbers = #tpu.dot_dimension_numbers<[1], [0], [0], [1], [0, 0, 1, 1], [], []>} : vector<8x32xbf16>, vector<32x128xbf16>, vector<8x128xf32> -> vector<8x128xf32>
    %30 = arith.addf %24, %29 : vector<8x128xf32>
    %c0_27 = arith.constant 0 : index
    %c0_28 = arith.constant 0 : index
    %c26 = arith.constant 26 : index
    %31 = vector.load %arg1[%c0_27, %c0_28, %c26] : memref<1x32x159xbf16, #tpu.memory_space<vmem>>, vector<1x32x128xbf16>
    %32 = vector.shape_cast %31 : vector<1x32x128xbf16> to vector<32x128xbf16>
    %c5_29 = arith.constant 5 : index
    %c0_30 = arith.constant 0 : index
    %c0_31 = arith.constant 0 : index
    %33 = vector.load %arg2[%c5_29, %c0_30, %c0_31] : memref<8x8x32xbf16, #tpu.memory_space<vmem>>, vector<1x8x32xbf16>
    %34 = vector.shape_cast %33 : vector<1x8x32xbf16> to vector<8x32xbf16>
    %cst_32 = arith.constant dense<0.000000e+00> : vector<8x128xf32>
    %35 = tpu.matmul %34, %32, %cst_32 {dimension_numbers = #tpu.dot_dimension_numbers<[1], [0], [0], [1], [0, 0, 1, 1], [], []>} : vector<8x32xbf16>, vector<32x128xbf16>, vector<8x128xf32> -> vector<8x128xf32>
    %36 = arith.addf %30, %35 : vector<8x128xf32>
    %c0_33 = arith.constant 0 : index
    %c0_34 = arith.constant 0 : index
    %c30 = arith.constant 30 : index
    %37 = vector.load %arg1[%c0_33, %c0_34, %c30] : memref<1x32x159xbf16, #tpu.memory_space<vmem>>, vector<1x32x128xbf16>
    %38 = vector.shape_cast %37 : vector<1x32x128xbf16> to vector<32x128xbf16>
    %c6_35 = arith.constant 6 : index
    %c0_36 = arith.constant 0 : index
    %c0_37 = arith.constant 0 : index
    %39 = vector.load %arg2[%c6_35, %c0_36, %c0_37] : memref<8x8x32xbf16, #tpu.memory_space<vmem>>, vector<1x8x32xbf16>
    %40 = vector.shape_cast %39 : vector<1x8x32xbf16> to vector<8x32xbf16>
    %cst_38 = arith.constant dense<0.000000e+00> : vector<8x128xf32>
    %41 = tpu.matmul %40, %38, %cst_38 {dimension_numbers = #tpu.dot_dimension_numbers<[1], [0], [0], [1], [0, 0, 1, 1], [], []>} : vector<8x32xbf16>, vector<32x128xbf16>, vector<8x128xf32> -> vector<8x128xf32>
    %42 = arith.addf %36, %41 : vector<8x128xf32>
    %c0_39 = arith.constant 0 : index
    %c0_40 = arith.constant 0 : index
    %c31 = arith.constant 31 : index
    %43 = vector.load %arg1[%c0_39, %c0_40, %c31] : memref<1x32x159xbf16, #tpu.memory_space<vmem>>, vector<1x32x128xbf16>
    %44 = vector.shape_cast %43 : vector<1x32x128xbf16> to vector<32x128xbf16>
    %c7 = arith.constant 7 : index
    %c0_41 = arith.constant 0 : index
    %c0_42 = arith.constant 0 : index
    %45 = vector.load %arg2[%c7, %c0_41, %c0_42] : memref<8x8x32xbf16, #tpu.memory_space<vmem>>, vector<1x8x32xbf16>
    %46 = vector.shape_cast %45 : vector<1x8x32xbf16> to vector<8x32xbf16>
    %cst_43 = arith.constant dense<0.000000e+00> : vector<8x128xf32>
    %47 = tpu.matmul %46, %44, %cst_43 {dimension_numbers = #tpu.dot_dimension_numbers<[1], [0], [0], [1], [0, 0, 1, 1], [], []>} : vector<8x32xbf16>, vector<32x128xbf16>, vector<8x128xf32> -> vector<8x128xf32>
    %48 = arith.addf %42, %47 : vector<8x128xf32>
    %c0_44 = arith.constant 0 : index
    %c0_45 = arith.constant 0 : index
    %49 = vector.load %arg3[%c0_44, %c0_45] : memref<8x1xf32, #tpu.memory_space<vmem>>, vector<8x1xf32>
    %50 = vector.broadcast %49 : vector<8x1xf32> to vector<8x128xf32>
    %51 = arith.addf %48, %50 : vector<8x128xf32>
    %c0_46 = arith.constant 0 : index
    %c0_47 = arith.constant 0 : index
    %52 = vector.load %arg4[%c0_46, %c0_47] : memref<1x128xf32, #tpu.memory_space<vmem>>, vector<1x128xf32>
    %53 = vector.broadcast %52 : vector<1x128xf32> to vector<8x128xf32>
    %54 = arith.mulf %51, %53 : vector<8x128xf32>
    %cst_48 = arith.constant dense<0.000000e+00> : vector<8xf32>
    %55 = vector.multi_reduction <add>, %54, %cst_48 [1] : vector<8x128xf32> to vector<8xf32>
    %56 = vector.shape_cast %55 : vector<8xf32> to vector<8x1xf32>
    %cst_49 = arith.constant 1.562500e-02 : f32
    %57 = vector.broadcast %cst_49 : f32 to vector<8x1xf32>
    %58 = arith.mulf %56, %57 : vector<8x1xf32>
    %59 = vector.broadcast %58 : vector<8x1xf32> to vector<8x128xf32>
    %60 = arith.subf %51, %59 : vector<8x128xf32>
    %61 = arith.mulf %60, %60 : vector<8x128xf32>
    %62 = vector.broadcast %52 : vector<1x128xf32> to vector<8x128xf32>
    %63 = arith.mulf %61, %62 : vector<8x128xf32>
    %cst_50 = arith.constant dense<0.000000e+00> : vector<8xf32>
    %64 = vector.multi_reduction <add>, %63, %cst_50 [1] : vector<8x128xf32> to vector<8xf32>
    %65 = vector.shape_cast %64 : vector<8xf32> to vector<8x1xf32>
    %cst_51 = arith.constant 1.562500e-02 : f32
    %66 = vector.broadcast %cst_51 : f32 to vector<8x1xf32>
    %67 = arith.mulf %65, %66 : vector<8x1xf32>
    %cst_52 = arith.constant 9.99999974E-6 : f32
    %68 = vector.broadcast %cst_52 : f32 to vector<8x1xf32>
    %69 = arith.addf %67, %68 : vector<8x1xf32>
    %70 = math.rsqrt %69 : vector<8x1xf32>
    %71 = vector.broadcast %70 : vector<8x1xf32> to vector<8x128xf32>
    %72 = arith.mulf %60, %71 : vector<8x128xf32>
    %cst_53 = arith.constant 0.000000e+00 : f32
    %73 = vector.broadcast %cst_53 : f32 to vector<8x128xf32>
    %74 = arith.cmpf oge, %72, %73 : vector<8x128xf32>
    %cst_54 = arith.constant 2.000000e-01 : f32
    %75 = vector.broadcast %cst_54 : f32 to vector<8x128xf32>
    %76 = arith.mulf %75, %72 : vector<8x128xf32>
    %77 = arith.select %74, %72, %76 : vector<8x128xi1>, vector<8x128xf32>
    %c0_55 = arith.constant 0 : index
    %c0_56 = arith.constant 0 : index
    %c0_57 = arith.constant 0 : index
    %78 = vector.load %arg5[%c0_55, %c0_56, %c0_57] : memref<1x8x128xf32, #tpu.memory_space<vmem>>, vector<1x8x128xf32>
    %79 = vector.shape_cast %78 : vector<1x8x128xf32> to vector<8x128xf32>
    %80 = vector.shape_cast %77 : vector<8x128xf32> to vector<1x8x128xf32>
    tpu.vector_store %arg5[%c0_55, %c0_56, %c0_57], %80 {strides = array<i32>} : memref<1x8x128xf32, #tpu.memory_space<vmem>>, vector<1x8x128xf32>,
    return
  }
  func.func @transform_0(%arg0: i32) -> (i32, i32, i32) {
    %c0_i32 = arith.constant 0 : i32
    %c0_i32_0 = arith.constant 0 : i32
    %c0_i32_1 = arith.constant 0 : i32
    return %arg0, %c0_i32, %c0_i32_0 : i32, i32, i32
  }
  func.func @transform_1(%arg0: i32) -> (i32, i32, i32) {
    %c0_i32 = arith.constant 0 : i32
    %c0_i32_0 = arith.constant 0 : i32
    %c0_i32_1 = arith.constant 0 : i32
    %c0_i32_2 = arith.constant 0 : i32
    return %c0_i32, %c0_i32_0, %c0_i32_1 : i32, i32, i32
  }
  func.func @transform_2(%arg0: i32) -> (i32, i32) {
    %c0_i32 = arith.constant 0 : i32
    %c0_i32_0 = arith.constant 0 : i32
    %c0_i32_1 = arith.constant 0 : i32
    return %c0_i32, %c0_i32_0 : i32, i32
  }
  func.func @transform_3(%arg0: i32) -> (i32, i32) {
    %c0_i32 = arith.constant 0 : i32
    %c0_i32_0 = arith.constant 0 : i32
    %c0_i32_1 = arith.constant 0 : i32
    return %c0_i32, %c0_i32_0 : i32, i32
  }
  func.func @transform_4(%arg0: i32) -> (i32, i32, i32) {
    %c0_i32 = arith.constant 0 : i32
    %c0_i32_0 = arith.constant 0 : i32
    %c0_i32_1 = arith.constant 0 : i32
    return %arg0, %c0_i32, %c0_i32_0 : i32, i32, i32
  }
}

</mosaic_0001>

<bundles_post_ra>
// kernel: conv3d_block.1
= control target key start
LH: loop header
LB: loop body
LE: loop exit
PB: predicated region body
PF: predicated region fallthrough
CT: control target
= control target key end

     0   :  { %s967_s15 = smov 0   ;;  %s1068_s0 = inlined_call_operand.vmem [shape: bf16[2,32,159], index: 0, kind: input, shape index: {}]   ;;  %s1069_s1 = inlined_call_operand.vmem [shape: bf16[8,8,32], index: 1, kind: input, shape index: {}]   ;;  %s1070_s2 = inlined_call_operand.vmem [shape: f32[8,1], index: 2, kind: input, shape index: {}]   ;;  %s1071_s3 = inlined_call_operand.vmem [shape: f32[1,128], index: 3, kind: input, shape index: {}]   ;;  %s1072_s4 = inlined_call_operand.vmem [shape: f32[2,8,128], index: 4, kind: output, shape index: {}]  }
   0x1 LB: > { %s774_s16 = sadd.s32 4294967295, %s930_s15   ;;  %p778_p0 = scmp.ge.s32.totalorder %s930_s15, 1  ;;  %s930_s15 = sphi %s967_s15, %s14_s15  }
   0x2   : > { %p162_p1 = scmp.lt.s32.totalorder %s930_s15, 3 }
   0x4   : > { %p163_p2 = pnand %p778_p0, %p162_p1 }
   0x5   : > { %p187_p3 = scmp.lt.s32.totalorder (!%p163_p2), %s774_s16, 1  ;;  %v932_v0 = vmov (!%p163_p2), 0.0   ;;  %s933_s21 = smov (!%p163_p2), 127   ;;  %vm934_vm0 = vmmov (!%p163_p2), 0   ;;  %vm237_vm1 = vcmask (!%p163_p2), 261120   ;;  %v941_v8 = vmov (!%p163_p2), 0  }
   0x6   : > { %166 = sbr.rel (%p163_p2) target bundleno = 719 (0x2cf), region = 36  ;;  %831 = vmatprep.subr.bf16.mxu0 (!%p163_p2), %v932_v0  ;;  %839 = vmatprep.subr.bf16.mxu1 (!%p163_p2), %v932_v0  ;;  %v201_v7 = vld [vmem:[%s1069_s1] sm:$0xf] (!%p163_p2)  ;;  %s935_s24 = smov (!%p163_p2), 123   ;;  %vm232_vm2 = vcmask (!%p163_p2), 1039360   ;;  %vm346_vm3 = vcmask (!%p163_p2), 1006592  }
   0x7   : > { %835 = vmatprep.mubr.msk.bf16.mxu0 (!%p163_p2), %vm934_vm0, %v932_v0  ;;  %843 = vmatprep.mubr.msk.bf16.mxu1 (!%p163_p2), %vm934_vm0, %v932_v0  ;;  %s936_s25 = smov (!%p163_p2), 122   ;;  %s937_s26 = smov (!%p163_p2), 103   ;;  %v690_v9 = vld [vmem:[%s1070_s2] sm:$0xff] (!%p163_p2)  ;;  %vm405_vm4 = vcmask (!%p163_p2), 998400   ;;  %v791_v26 = vld [vmem:[%s1069_s1 + $0x8] sm:$0xf] (!%p163_p2) }
   0x8   : > { %s938_s27 = smov (!%p163_p2), 102   ;;  %s939_s28 = smov (!%p163_p2), 98   ;;  %913 = vset.pattern.permute.xlu0 (!%p163_p2), %v941_v8  ;;  %v782_v18 = vld [vmem:[%s1069_s1 + $0x4] sm:$0xf] (!%p163_p2)  ;;  %vm464_vm5 = vcmask (!%p163_p2), 842752   ;;  %vm523_vm6 = vcmask (!%p163_p2), 834560  }
   0x9   : > { %s940_s29 = smov (!%p163_p2), 97   ;;  %v793_v30 = vld [vmem:[%s1069_s1 + $0xc] sm:$0xf] (!%p163_p2)  ;;  %v795_v40 = vld [vmem:[%s1069_s1 + $0x10] sm:$0xf] (!%p163_p2)  ;;  %vm582_vm7 = vcmask (!%p163_p2), 801792  }
   0xa   : > { %v797_v44 = vld [vmem:[%s1069_s1 + $0x14] sm:$0xf] (!%p163_p2)  ;;  %vm641_vm8 = vcmask (!%p163_p2), 793600   ;;  %v799_v54 = vld [vmem:[%s1069_s1 + $0x18] sm:$0xf] (!%p163_p2) }
   0xb   : > { %v801_v58 = vld [vmem:[%s1069_s1 + $0x1c] sm:$0xf] (!%p163_p2) }
   0xd   : > { %s1074_s16 = smov (!%p187_p3, %s774_s16), 1 }
   0xe   : > { %s806_s17 = sshll.u32 %s1074_s16, 5 }
   0xf   : > { %s191_s20 = scalar_lea.vmem %s1068_s0, %s806_s17 }
  0x10   : > { %v914_v1 = vld [vmem:[%s191_s20 + $0x10] ss:$8 sps:$4 sm:$0xff]   ;;  %v916_v2 = vld [vmem:[%s191_s20] ss:$8 sps:$4 sm:$0xff]   ;;  %v918_v3 = vld [vmem:[%s191_s20 + $0x14] ss:$8 sps:$4 sm:$0xff]  }
  0x11   : > { %228 = vrot.lane.b32.xlu1 %v914_v1, %s933_s21  ;;  %v919_v4 = vld [vmem:[%s191_s20 + $0x4] ss:$8 sps:$4 sm:$0xff]   ;;  %224 = vrot.lane.b32.xlu0 %v916_v2, %s933_s21  ;;  %v920_v5 = vld [vmem:[%s191_s20] ss:$8 sps:$4 sm:$0xff]  }
  0x12   : > { %840 = vmatpush3.bf16.msra.mxu1 %v920_v5  ;;  %v921_v6 = vld [vmem:[%s191_s20 + $0x10] ss:$8 sps:$4 sm:$0xff]  }
  0x13   : > { %841 = vmatprep.subr.bf16.mxu1 %v932_v0 }
  0x15   : > { %230 = vrot.lane.b32.xlu1 %v918_v3, %s933_s21  ;;  %226 = vrot.lane.b32.xlu0 %v919_v4, %s933_s21 }
  0x16   : > { %842 = vmatpush3.bf16.msra.mxu1 %v921_v6 }
  0x17   : > { %855 = vmatprep.subr.bf16.mxu1 %v932_v0 }
  0x19   : > { %340 = vrot.lane.b32.xlu1 %v919_v4, %s935_s24  ;;  %338 = vrot.lane.b32.xlu0 %v916_v2, %s935_s24 }
  0x1a   : > { %844 = vmatmul.mubr.msk.bf16.vlgmr.msra.gmra.mrb[0].mxu1 %vm237_vm1, %v201_v7 }
  0x1b   : > { %859 = vmatprep.mubr.msk.bf16.mxu1 %vm934_vm0, %v932_v0 }
  0x1d   : > { %399 = vrot.lane.b32.xlu1 %v919_v4, %s936_s25  ;;  %397 = vrot.lane.b32.xlu0 %v916_v2, %s936_s25 }
  0x21   : > { %344 = vrot.lane.b32.xlu1 %v918_v3, %s935_s24  ;;  %342 = vrot.lane.b32.xlu0 %v914_v1, %s935_s24  ;;  %s781_s24 = sshll.u32 %s1074_s16, 3 }
  0x25   : > { %403 = vrot.lane.b32.xlu1 %v918_v3, %s936_s25  ;;  %401 = vrot.lane.b32.xlu0 %v914_v1, %s936_s25 }
  0x29   : > { %458 = vrot.lane.b32.xlu1 %v919_v4, %s937_s26  ;;  %456 = vrot.lane.b32.xlu0 %v916_v2, %s937_s26 }
  0x2d   : > { %517 = vrot.lane.b32.xlu1 %v919_v4, %s938_s27  ;;  %515 = vrot.lane.b32.xlu0 %v916_v2, %s938_s27 }
  0x31   : > { %462 = vrot.lane.b32.xlu1 %v918_v3, %s937_s26  ;;  %460 = vrot.lane.b32.xlu0 %v914_v1, %s937_s26 }
  0x35   : > { %521 = vrot.lane.b32.xlu1 %v918_v3, %s938_s27  ;;  %519 = vrot.lane.b32.xlu0 %v914_v1, %s938_s27  ;;  %s195_s27 = scalar_lea.vmem %s1072_s4, %s781_s24 }
  0x39   : > { %576 = vrot.lane.b32.xlu1 %v919_v4, %s939_s28  ;;  %574 = vrot.lane.b32.xlu0 %v916_v2, %s939_s28 }
  0x3d   : > { %635 = vrot.lane.b32.xlu1 %v919_v4, %s940_s29  ;;  %633 = vrot.lane.b32.xlu0 %v916_v2, %s940_s29 }
  0x41   : > { %580 = vrot.lane.b32.xlu1 %v918_v3, %s939_s28  ;;  %578 = vrot.lane.b32.xlu0 %v914_v1, %s939_s28 }
  0x45   : > { %639 = vrot.lane.b32.xlu1 %v918_v3, %s940_s29  ;;  %637 = vrot.lane.b32.xlu0 %v914_v1, %s940_s29 }
  0x49   : > { %693 = vperm.xlu0 %913, %v690_v9  }
  0x83   : > { %v229_v10 = vpop.permute.xlu1 %228  ;;  %v225_v11 = vpop.permute.xlu0 %224 }
  0x87   : > { %v231_v12 = vpop.permute.xlu1 %230  ;;  %v227_v13 = vpop.permute.xlu0 %226 }
  0x88   : > { %v233_v14 = vsel %vm232_vm2, %v225_v11, %v227_v13  ;;  %v234_v17 = vsel %vm232_vm2, %v229_v10, %v231_v12 }
  0x89   : > { %832 = vmatpush3.bf16.msra.mxu0 %v233_v14 }
  0x8a   : > { %833 = vmatprep.subr.bf16.mxu0 %v932_v0 }
  0x8b   : > { %v341_v15 = vpop.permute.xlu1 %340  ;;  %v339_v16 = vpop.permute.xlu0 %338 }
  0x8c   : > { %v347_v21 = vsel %vm346_vm3, %v339_v16, %v341_v15 }
  0x8d   : > { %834 = vmatpush3.bf16.msra.mxu0 %v234_v17 }
  0x8e   : > { %847 = vmatprep.subr.bf16.mxu0 %v932_v0 }
  0x8f   : > { %v400_v19 = vpop.permute.xlu1 %399  ;;  %v398_v20 = vpop.permute.xlu0 %397 }
  0x90   : > { %v406_v22 = vsel %vm405_vm4, %v398_v20, %v400_v19  ;;  %836 = vmatmul.mubr.msk.bf16.vlgmr.msra.gmra.mrb[0].mxu0 %vm237_vm1, %v782_v18 }
  0x91   : > { %848 = vmatpush3.bf16.msra.mxu0 %v347_v21  ;;  %856 = vmatpush3.bf16.msra.mxu1 %v406_v22 }
  0x92   : > { %849 = vmatprep.subr.bf16.mxu0 %v932_v0  ;;  %857 = vmatprep.subr.bf16.mxu1 %v932_v0 }
  0x93   : > { %v345_v23 = vpop.permute.xlu1 %344  ;;  %v343_v24 = vpop.permute.xlu0 %342  ;;  %851 = vmatprep.mubr.msk.bf16.mxu0 %vm934_vm0, %v932_v0 }
  0x94   : > { %v348_v25 = vsel %vm346_vm3, %v343_v24, %v345_v23 }
  0x95   : > { %850 = vmatpush3.bf16.msra.mxu0 %v348_v25 }
  0x96   : > { %863 = vmatprep.subr.bf16.mxu0 %v932_v0 }
  0x97   : > { %v404_v27 = vpop.permute.xlu1 %403  ;;  %v402_v28 = vpop.permute.xlu0 %401 }
  0x98   : > { %v407_v29 = vsel %vm405_vm4, %v402_v28, %v404_v27  ;;  %852 = vmatmul.mubr.msk.bf16.vlgmr.msra.gmra.mrb[4].mxu0 %vm237_vm1, %v791_v26 }
  0x99   : > { %858 = vmatpush3.bf16.msra.mxu1 %v407_v29  ;;  %867 = vmatprep.mubr.msk.bf16.mxu0 %vm934_vm0, %v932_v0 }
  0x9a   : > { %871 = vmatprep.subr.bf16.mxu1 %v932_v0 }
  0x9b   : > { %v459_v31 = vpop.permute.xlu1 %458  ;;  %v457_v32 = vpop.permute.xlu0 %456 }
  0x9c   : > { %v465_v33 = vsel %vm464_vm5, %v457_v32, %v459_v31  ;;  %860 = vmatmul.mubr.msk.bf16.vlgmr.msra.gmra.mrb[4].mxu1 %vm237_vm1, %v793_v30 }
  0x9d   : > { %864 = vmatpush3.bf16.msra.mxu0 %v465_v33  ;;  %875 = vmatprep.mubr.msk.bf16.mxu1 %vm934_vm0, %v932_v0 }
  0x9e   : > { %865 = vmatprep.subr.bf16.mxu0 %v932_v0 }
  0x9f   : > { %v518_v34 = vpop.permute.xlu1 %517  ;;  %v516_v35 = vpop.permute.xlu0 %515 }
  0xa0   : > { %v524_v36 = vsel %vm523_vm6, %v516_v35, %v518_v34  ;;  %v803_v34 = vld [vmem:[%s1071_s3] ss:$0 sm:$0xff] }
  0xa1   : > { %872 = vmatpush3.bf16.msra.mxu1 %v524_v36 }
  0xa2   : > { %873 = vmatprep.subr.bf16.mxu1 %v932_v0 }
  0xa3   : > { %v463_v37 = vpop.permute.xlu1 %462  ;;  %v461_v38 = vpop.permute.xlu0 %460 }
  0xa4   : > { %v466_v39 = vsel %vm464_vm5, %v461_v38, %v463_v37 }
  0xa5   : > { %866 = vmatpush3.bf16.msra.mxu0 %v466_v39 }
  0xa6   : > { %879 = vmatprep.subr.bf16.mxu0 %v932_v0 }
  0xa7   : > { %v522_v41 = vpop.permute.xlu1 %521  ;;  %v520_v42 = vpop.permute.xlu0 %519 }
  0xa8   : > { %v525_v43 = vsel %vm523_vm6, %v520_v42, %v522_v41  ;;  %868 = vmatmul.mubr.msk.bf16.vlgmr.msra.gmra.mrb[8].mxu0 %vm237_vm1, %v795_v40 }
  0xa9   : > { %874 = vmatpush3.bf16.msra.mxu1 %v525_v43  ;;  %883 = vmatprep.mubr.msk.bf16.mxu0 %vm934_vm0, %v932_v0 }
  0xaa   : > { %887 = vmatprep.subr.bf16.mxu1 %v932_v0 }
  0xab   : > { %v577_v45 = vpop.permute.xlu1 %576  ;;  %v575_v46 = vpop.permute.xlu0 %574 }
  0xac   : > { %v583_v47 = vsel %vm582_vm7, %v575_v46, %v577_v45  ;;  %876 = vmatmul.mubr.msk.bf16.vlgmr.msra.gmra.mrb[8].mxu1 %vm237_vm1, %v797_v44 }
  0xad   : > { %880 = vmatpush3.bf16.msra.mxu0 %v583_v47  ;;  %891 = vmatprep.mubr.msk.bf16.mxu1 %vm934_vm0, %v932_v0 }
  0xae   : > { %881 = vmatprep.subr.bf16.mxu0 %v932_v0 }
  0xaf   : > { %v636_v48 = vpop.permute.xlu1 %635  ;;  %v634_v49 = vpop.permute.xlu0 %633 }
  0xb0   : > { %v642_v50 = vsel %vm641_vm8, %v634_v49, %v636_v48 }
  0xb1   : > { %888 = vmatpush3.bf16.msra.mxu1 %v642_v50 }
  0xb2   : > { %889 = vmatprep.subr.bf16.mxu1 %v932_v0 }
  0xb3   : > { %v581_v51 = vpop.permute.xlu1 %580  ;;  %v579_v52 = vpop.permute.xlu0 %578 }
  0xb4   : > { %v584_v53 = vsel %vm582_vm7, %v579_v52, %v581_v51 }
  0xb5   : > { %882 = vmatpush3.bf16.msra.mxu0 %v584_v53 }
  0xb7   : > { %v640_v55 = vpop.permute.xlu1 %639  ;;  %v638_v56 = vpop.permute.xlu0 %637 }
  0xb8   : > { %v643_v57 = vsel %vm641_vm8, %v638_v56, %v640_v55  ;;  %884 = vmatmul.mubr.msk.bf16.vlgmr.msra.gmra.mrb[12].mxu0 %vm237_vm1, %v799_v54 }
  0xb9   : > { %890 = vmatpush3.bf16.msra.mxu1 %v643_v57 }
  0xbc   : > { %892 = vmatmul.mubr.msk.bf16.vlgmr.msra.gmra.mrb[12].mxu1 %vm237_vm1, %v801_v58 }
  0xc8   : > { %v694_v30 = vpop.permute.xlu0 %693 }
  0xed   : > { %v330_v59 = vpop.f32.mrb[0].mxu1 }
  0xee   : > { %v845_v60 = vpop.f32.mrb[1].mxu1 }
  0xef   : > { %v333_v61 = vpop.f32.mrb[2].mxu1 }
  0xf0   : > { %v846_v62 = vpop.f32.mrb[3].mxu1 }
 0x163   : > { %v275_v63 = vpop.f32.mrb[0].mxu0 }
 0x164   : > { %v837_v0 = vpop.f32.mrb[1].mxu0  ;;  %v331_v1 = vadd.f32 %v330_v59, %v275_v63 }
 0x165   : > { %v278_v2 = vpop.f32.mrb[2].mxu0 }
 0x166   : > { %v838_v3 = vpop.f32.mrb[3].mxu0 }
 0x16b   : > { %v388_v4 = vpop.f32.mrb[4].mxu0 }
 0x16c   : > { %v394_v5 = vadd.f32 %v388_v4, %v331_v1  ;;  %v853_v6 = vpop.f32.mrb[5].mxu0 }
 0x16d   : > { %v391_v7 = vpop.f32.mrb[6].mxu0 }
 0x16e   : > { %v854_v8 = vpop.f32.mrb[7].mxu0 }
 0x16f   : > { %v447_v9 = vpop.f32.mrb[4].mxu1 }
 0x170   : > { %v453_v10 = vadd.f32 %v447_v9, %v394_v5  ;;  %v861_v11 = vpop.f32.mrb[5].mxu1 }
 0x171   : > { %v450_v12 = vpop.f32.mrb[6].mxu1 }
 0x172   : > { %v862_v13 = vpop.f32.mrb[7].mxu1 }
 0x17b   : > { %v506_v14 = vpop.f32.mrb[8].mxu0 }
 0x17c   : > { %v512_v15 = vadd.f32 %v506_v14, %v453_v10  ;;  %v869_v16 = vpop.f32.mrb[9].mxu0 }
 0x17d   : > { %v509_v17 = vpop.f32.mrb[10].mxu0 }
 0x17e   : > { %v870_v18 = vpop.f32.mrb[11].mxu0 }
 0x17f   : > { %v565_v19 = vpop.f32.mrb[8].mxu1 }
 0x180   : > { %v571_v20 = vadd.f32 %v565_v19, %v512_v15  ;;  %v877_v21 = vpop.f32.mrb[9].mxu1 }
 0x181   : > { %v568_v22 = vpop.f32.mrb[10].mxu1 }
 0x182   : > { %v878_v23 = vpop.f32.mrb[11].mxu1 }
 0x18b   : > { %v624_v24 = vpop.f32.mrb[12].mxu0 }
 0x18c   : > { %v630_v25 = vadd.f32 %v624_v24, %v571_v20  ;;  %v885_v26 = vpop.f32.mrb[13].mxu0 }
 0x18d   : > { %v627_v27 = vpop.f32.mrb[14].mxu0 }
 0x18e   : > { %v886_v28 = vpop.f32.mrb[15].mxu0 }
 0x18f   : > { %v683_v29 = vpop.f32.mrb[12].mxu1 }
 0x190   : > { %v689_v31 = vadd.f32 %v683_v29, %v630_v25  ;;  %v893_v32 = vpop.f32.mrb[13].mxu1 }
 0x191   : > { %v686_v33 = vpop.f32.mrb[14].mxu1 }
 0x192   : > { %v696_v35 = vadd.f32 %v694_v30, %v689_v31  ;;  %v894_v36 = vpop.f32.mrb[15].mxu1 }
 0x194   : > { %v704_v37 = vmul.f32 %v803_v34, %v696_v35 }
 0x196   : > { %705 = vadd.xlane.f32.xlu1 %v704_v37 }
 0x223   : > { %v706_v38 = vpop.xlane.xlu1 %705 }
 0x224   : > { %v707_v39 = vmul.f32 0.015625, %v706_v38 }
 0x226   : > { %v708_v40 = vsub.f32 %v696_v35, %v707_v39 }
 0x228   : > { %v709_v41 = vmul.f32 %v708_v40, %v708_v40 }
 0x22a   : > { %v710_v42 = vmul.f32 %v803_v34, %v709_v41 }
 0x22c   : > { %711 = vadd.xlane.f32.xlu0 %v710_v42 }
 0x2b9   : > { %v712_v43 = vpop.xlane.xlu0 %711 }
 0x2ba   : > { %v713_v44 = vmul.f32 0.015625, %v712_v43 }
 0x2bc   : > { %v714_v45 = vadd.f32 1e-05, %v713_v44 }
 0x2be   : > { %922 = vrsqrt.f32 %v714_v45 }
 0x2c8   : > { %v923_v46 = vpop.eup %922 }
 0x2c9   : > { %v716_v47 = vmul.f32 %v923_v46, %v708_v40 }
 0x2cb   : > { %vm717_vm9 = vcmp.ge.f32.partialorder %v716_v47, 0.0  ;;  %v718_v48 = vmul.f32 0.2, %v716_v47 }
 0x2cd   : > { %v719_v49 = vsel %vm717_vm9, %v716_v47, %v718_v48 }
 0x2ce   : > { %720 = vst [vmem:[%s195_s27] sm:$0xff] %v719_v49 }
 0x2cf PF: > { %s14_s15 = sadd.s32 1, %s930_s15  }
 0x2d0   : > { %p11_p4 = scmp.ge.s32.totalorder %s14_s15, 4  }
 0x2d2   :  { %13 = sbr.rel (!%p11_p4) target bundleno = 1 (0x1), region = 73 }

</bundles_post_ra>
